<compile_context>
chip_gen: v5e
topology: v5e:2x2
jax: 0.10.0
libtpu: 0.0.40
codegen_flags: <defaults>
</compile_context>

<pallas_src>
import functools

import numpy as np
import jax
import jax.numpy as jnp
from jax.experimental import pallas as pl
from jax.experimental.pallas import tpu as pltpu


# ----------------------------- Pallas kernel -----------------------------

def kl_div_kernel(x_ref, y_ref, out_ref, *, n_valid, tile_rows, tiles_per_chunk):
    # x_ref, y_ref : (Tm, D) row tiles in the ORIGINAL input dtype (cast here)
    # out_ref      : (Tm, 1) f32 per-chunk partial sums, resident in VMEM
    #                across the inner (reduction) grid axis.
    c = pl.program_id(0)          # parallel chunk axis (one per TC on v7x)
    t = pl.program_id(1)          # sequential reduction axis within the chunk

    @pl.when(t == 0)
    def _():
        out_ref[...] = jnp.zeros_like(out_ref)

    x = x_ref[...].astype(jnp.float32)          # (Tm, D)
    y = y_ref[...].astype(jnp.float32)          # (Tm, D)

    # Stable, folded softmax-KL:
    #   p = ex/Sx, q = ey/Sy, logq = ys - log(Sy)
    #   sum_d q*(logq - p) = A/Sy - log(Sy) - B/(Sy*Sx)
    xm = jnp.max(x, axis=-1, keepdims=True)
    ym = jnp.max(y, axis=-1, keepdims=True)
    ex = jnp.exp(x - xm)                         # (Tm, D)
    ys = y - ym                                  # (Tm, D)
    ey = jnp.exp(ys)                             # (Tm, D)

    sx = jnp.sum(ex, axis=-1, keepdims=True)     # (Tm, 1)
    sy = jnp.sum(ey, axis=-1, keepdims=True)     # (Tm, 1)
    a = jnp.sum(ey * ys, axis=-1, keepdims=True)  # (Tm, 1)
    b = jnp.sum(ey * ex, axis=-1, keepdims=True)  # (Tm, 1)

    # Divides only touch (Tm, 1) row sums -> negligible cost, kept exact.
    inv_sy = 1.0 / sy
    row_loss = a * inv_sy - jnp.log(sy) - b * (inv_sy / sx)   # (Tm, 1)

    # Mask rows past the true row count (ragged last tile / clamped duplicate
    # tiles).  The select also discards any NaN/Inf from garbage padding rows.
    tile_idx = c * tiles_per_chunk + t
    row = (jax.lax.broadcasted_iota(jnp.int32, row_loss.shape, 0)
           + tile_idx * tile_rows)
    row_loss = jnp.where(row < n_valid, row_loss, 0.0)

    out_ref[...] += row_loss


# ----------------------------- wrapper -----------------------------

def _round_up(a, m):
    return ((a + m - 1) // m) * m


def _cdiv(a, b):
    return (a + b - 1) // b


def _pick_tile_rows(n_rows, d, in_itemsize):
    # Steady-state VMEM per row of tile:
    #   2 inputs x 2 pipeline buffers (input dtype) + ~4 concurrent f32 temps.
    bytes_per_row = d * (2 * 2 * in_itemsize + 4 * 4)
    budget = 12 * 1024 * 1024            # conservative across v5e / v6e / v7x
    cap = max(8, (budget // bytes_per_row) // 8 * 8)
    return int(max(8, min(1024, _round_up(n_rows, 8), cap)))


@jax.jit
def lp_kl_divergence_forward(x, y):
    D = x.shape[-1]
    # Keep the original dtype (no HBM-doubling upcast); cast in VMEM instead.
    x2 = x.reshape(-1, D)
    y2 = y.reshape(-1, D)
    N = x2.shape[0]

    tile_rows = _pick_tile_rows(N, D, x2.dtype.itemsize)
    tiles_total = _cdiv(N, tile_rows)
    n_chunks = 2 if tiles_total >= 2 else 1       # v7x: one chunk per TensorCore
    tpc = _cdiv(tiles_total, n_chunks)            # tiles per chunk

    def in_map(c, t):
        # Clamp so a ragged last chunk never indexes past the real tiles; any
        # duplicated tile is zeroed by the in-kernel row mask.
        return (jnp.minimum(c * tpc + t, tiles_total - 1), 0)

    kernel = functools.partial(kl_div_kernel, n_valid=N, tile_rows=tile_rows,
                               tiles_per_chunk=tpc)

    per_row_sums = pl.pallas_call(
        kernel,
        out_shape=jax.ShapeDtypeStruct((n_chunks * tile_rows, 1), jnp.float32),
        grid_spec=pltpu.PrefetchScalarGridSpec(
            num_scalar_prefetch=0,
            grid=(n_chunks, tpc),
            in_specs=[
                pl.BlockSpec((tile_rows, D), in_map),
                pl.BlockSpec((tile_rows, D), in_map),
            ],
            # Each chunk owns its own (tile_rows, 1) block, resident across
            # the inner reduction axis (accumulator pattern).
            out_specs=pl.BlockSpec((tile_rows, 1), lambda c, t: (c, 0)),
        ),
        compiler_params=pltpu.CompilerParams(
            dimension_semantics=("parallel", "arbitrary"),
            vmem_limit_bytes=32 * 1024 * 1024),
    )(x2, y2)

    # 'batchmean': tiny final reduce + scale done in XLA.
    return jnp.sum(per_row_sums) / N


# ----------------------------- pure-JAX reference -----------------------------

def lp_kl_divergence_reference(x, y):
    D = x.shape[-1]
    x2 = x.reshape(-1, D).astype(jnp.float32)
    y2 = y.reshape(-1, D).astype(jnp.float32)
    p = jax.nn.softmax(x2, axis=-1)            # module passes probs as "input"
    logq = jax.nn.log_softmax(y2, axis=-1)
    q = jnp.exp(logq)
    pointwise = q * (logq - p)
    return jnp.sum(pointwise) / x2.shape[0]    # reduction='batchmean'


# ----------------------------- main -----------------------------

if __name__ == "__main__":
    B, S, D = 2, 8, 32                          # -> N = 16 rows of embed_dim 32

    key = jax.random.PRNGKey(0)
    kx, ky = jax.random.split(key)
    x = jax.random.normal(kx, (B, S, D), jnp.float32)
    y = jax.random.normal(ky, (B, S, D), jnp.float32)

    out = lp_kl_divergence_forward(x, y)
    out = jax.block_until_ready(out)

    ref = lp_kl_divergence_reference(x, y)
    ref = jax.block_until_ready(ref)

    np.testing.assert_allclose(np.asarray(out), np.asarray(ref),
                               rtol=1e-4, atol=1e-5)
    print("KERNEL_OK")
</pallas_src>

<mosaic_0001>
module attributes {stable_mosaic.version = 11 : i64} {
  func.func @kl_div_kernel(%arg0: i32, %arg1: i32, %arg2: memref<16x32xf32, #tpu.memory_space<vmem>>, %arg3: memref<16x32xf32, #tpu.memory_space<vmem>>, %arg4: memref<16x1xf32, #tpu.memory_space<vmem>>) attributes {dimension_semantics = [#tpu.dimension_semantics<parallel>, #tpu.dimension_semantics<arbitrary>], iteration_bounds = array<i64: 1, 1>, scalar_prefetch = 0 : i64, scratch_operands = 0 : i64, tpu.core_type = #tpu.core_type<tc>, window_params = [{transform_indices = @transform_0, window_bounds = array<i64: 16, 32>}, {transform_indices = @transform_1, window_bounds = array<i64: 16, 32>}, {transform_indices = @transform_2, window_bounds = array<i64: 16, 1>}]} {
    %c0_i32 = arith.constant 0 : i32
    %0 = arith.cmpi eq, %arg1, %c0_i32 : i32
    %1 = arith.extui %0 : i1 to i32
    %c0_i32_0 = arith.constant 0 : i32
    %2 = arith.cmpi ne, %1, %c0_i32_0 : i32
    scf.if %2 {
      %cst_16 = arith.constant 0.000000e+00 : f32
      %46 = vector.broadcast %cst_16 : f32 to vector<16x1xf32>
      %c0_17 = arith.constant 0 : index
      %c0_18 = arith.constant 0 : index
      %47 = vector.load %arg4[%c0_17, %c0_18] : memref<16x1xf32, #tpu.memory_space<vmem>>, vector<16x1xf32>
      tpu.vector_store %arg4[%c0_17, %c0_18], %46 {strides = array<i32>} : memref<16x1xf32, #tpu.memory_space<vmem>>, vector<16x1xf32>,
    } else {
    }
    %c0 = arith.constant 0 : index
    %c0_1 = arith.constant 0 : index
    %3 = vector.load %arg2[%c0, %c0_1] : memref<16x32xf32, #tpu.memory_space<vmem>>, vector<16x32xf32>
    %c0_2 = arith.constant 0 : index
    %c0_3 = arith.constant 0 : index
    %4 = vector.load %arg3[%c0_2, %c0_3] : memref<16x32xf32, #tpu.memory_space<vmem>>, vector<16x32xf32>
    %cst = arith.constant dense<0xFF800000> : vector<16xf32>
    %5 = vector.multi_reduction <maximumf>, %3, %cst [1] : vector<16x32xf32> to vector<16xf32>
    %6 = vector.shape_cast %5 : vector<16xf32> to vector<16x1xf32>
    %cst_4 = arith.constant dense<0xFF800000> : vector<16xf32>
    %7 = vector.multi_reduction <maximumf>, %4, %cst_4 [1] : vector<16x32xf32> to vector<16xf32>
    %8 = vector.shape_cast %7 : vector<16xf32> to vector<16x1xf32>
    %9 = vector.broadcast %6 : vector<16x1xf32> to vector<16x32xf32>
    %10 = arith.subf %3, %9 : vector<16x32xf32>
    %11 = math.exp %10 : vector<16x32xf32>
    %12 = vector.broadcast %8 : vector<16x1xf32> to vector<16x32xf32>
    %13 = arith.subf %4, %12 : vector<16x32xf32>
    %14 = math.exp %13 : vector<16x32xf32>
    %cst_5 = arith.constant dense<0.000000e+00> : vector<16xf32>
    %15 = vector.multi_reduction <add>, %11, %cst_5 [1] : vector<16x32xf32> to vector<16xf32>
    %16 = vector.shape_cast %15 : vector<16xf32> to vector<16x1xf32>
    %cst_6 = arith.constant dense<0.000000e+00> : vector<16xf32>
    %17 = vector.multi_reduction <add>, %14, %cst_6 [1] : vector<16x32xf32> to vector<16xf32>
    %18 = vector.shape_cast %17 : vector<16xf32> to vector<16x1xf32>
    %19 = arith.mulf %14, %13 : vector<16x32xf32>
    %cst_7 = arith.constant dense<0.000000e+00> : vector<16xf32>
    %20 = vector.multi_reduction <add>, %19, %cst_7 [1] : vector<16x32xf32> to vector<16xf32>
    %21 = vector.shape_cast %20 : vector<16xf32> to vector<16x1xf32>
    %22 = arith.mulf %14, %11 : vector<16x32xf32>
    %cst_8 = arith.constant dense<0.000000e+00> : vector<16xf32>
    %23 = vector.multi_reduction <add>, %22, %cst_8 [1] : vector<16x32xf32> to vector<16xf32>
    %24 = vector.shape_cast %23 : vector<16xf32> to vector<16x1xf32>
    %cst_9 = arith.constant 1.000000e+00 : f32
    %25 = vector.broadcast %cst_9 : f32 to vector<16x1xf32>
    %26 = arith.divf %25, %18 : vector<16x1xf32>
    %27 = arith.mulf %21, %26 : vector<16x1xf32>
    %28 = math.log %18 : vector<16x1xf32>
    %29 = arith.subf %27, %28 : vector<16x1xf32>
    %30 = arith.divf %26, %16 : vector<16x1xf32>
    %31 = arith.mulf %24, %30 : vector<16x1xf32>
    %32 = arith.subf %29, %31 : vector<16x1xf32>
    %c1_i32 = arith.constant 1 : i32
    %33 = arith.muli %arg0, %c1_i32 : i32
    %34 = arith.addi %33, %arg1 : i32
    %35 = tpu.iota {dimensions = array<i32: 0>} : vector<16x1xi32>
    %c16_i32 = arith.constant 16 : i32
    %36 = arith.muli %34, %c16_i32 : i32
    %37 = vector.broadcast %36 : i32 to vector<16x1xi32>
    %38 = arith.addi %35, %37 : vector<16x1xi32>
    %c16_i32_10 = arith.constant 16 : i32
    %39 = vector.broadcast %c16_i32_10 : i32 to vector<16x1xi32>
    %40 = arith.cmpi slt, %38, %39 : vector<16x1xi32>
    %cst_11 = arith.constant 0.000000e+00 : f32
    %41 = vector.broadcast %cst_11 : f32 to vector<16x1xf32>
    %42 = arith.select %40, %32, %41 : vector<16x1xi1>, vector<16x1xf32>
    %c0_12 = arith.constant 0 : index
    %c0_13 = arith.constant 0 : index
    %43 = vector.load %arg4[%c0_12, %c0_13] : memref<16x1xf32, #tpu.memory_space<vmem>>, vector<16x1xf32>
    %44 = arith.addf %43, %42 : vector<16x1xf32>
    %c0_14 = arith.constant 0 : index
    %c0_15 = arith.constant 0 : index
    %45 = vector.load %arg4[%c0_14, %c0_15] : memref<16x1xf32, #tpu.memory_space<vmem>>, vector<16x1xf32>
    tpu.vector_store %arg4[%c0_14, %c0_15], %44 {strides = array<i32>} : memref<16x1xf32, #tpu.memory_space<vmem>>, vector<16x1xf32>,
    return
  }
  func.func @transform_0(%arg0: i32, %arg1: i32) -> (i32, i32) {
    %c1_i32 = arith.constant 1 : i32
    %0 = arith.muli %arg0, %c1_i32 : i32
    %1 = arith.addi %0, %arg1 : i32
    %c0_i32 = arith.constant 0 : i32
    %2 = arith.minsi %1, %c0_i32 : i32
    %c0_i32_0 = arith.constant 0 : i32
    %c0_i32_1 = arith.constant 0 : i32
    return %2, %c0_i32_0 : i32, i32
  }
  func.func @transform_1(%arg0: i32, %arg1: i32) -> (i32, i32) {
    %c1_i32 = arith.constant 1 : i32
    %0 = arith.muli %arg0, %c1_i32 : i32
    %1 = arith.addi %0, %arg1 : i32
    %c0_i32 = arith.constant 0 : i32
    %2 = arith.minsi %1, %c0_i32 : i32
    %c0_i32_0 = arith.constant 0 : i32
    %c0_i32_1 = arith.constant 0 : i32
    return %2, %c0_i32_0 : i32, i32
  }
  func.func @transform_2(%arg0: i32, %arg1: i32) -> (i32, i32) {
    %c0_i32 = arith.constant 0 : i32
    %c0_i32_0 = arith.constant 0 : i32
    return %arg0, %c0_i32 : i32, i32
  }
}

</mosaic_0001>

<bundles_post_ra>
// kernel: lp_kl_divergence_forward.1
= control target key start
LH: loop header
LB: loop body
LE: loop exit
PB: predicated region body
PF: predicated region fallthrough
CT: control target
= control target key end

     0   :  { %7 = vsyncpa [#allocation3], 0  ;;  %s380_s0 = inlined_call_operand.hbm [shape: f32[16,32], index: 0, kind: input, shape index: {}]   ;;  %s381_s1 = inlined_call_operand.hbm [shape: f32[16,32], index: 1, kind: input, shape index: {}]   ;;  %s382_s2 = inlined_call_operand.vmem [shape: f32[16,1], index: 2, kind: output, shape index: {}]  }
   0x1   :  { %s19_s11 = sshll.u32 %s380_s0, 4  ;;  %s20_s11 = int_to_ptr.hbm [resolvable:$true] %s19_s11 }
   0x2   :  { %8 = vsyncpa [#allocation5], 0  ;;  %s305_s12 = smov [#allocation2]   ;;  %s38_s16 = sshll.u32 %s381_s1, 4  ;;  %s39_s16 = int_to_ptr.hbm [resolvable:$true] %s38_s16 }
   0x3   :  { %s21_s13 = sshll.u32 %s305_s12, 4  ;;  %s306_s17 = smov 128   ;;  %s22_s13 = int_to_ptr.vmem [resolvable:$true] %s21_s13 }
   0x4   :  { %s307_s18 = smov 8   ;;  %s308_s19 = smov [#allocation4]  }
   0x5   :  { %27 = dma.hbm_to_vmem [thread:$0]  %s20_s11, 256, %s22_s13, [#allocation3], %s306_s17, %s306_s17, %s307_s18  }
   0x6   :  { %s40_s20 = sshll.u32 %s308_s19, 4  ;;  %s41_s20 = int_to_ptr.vmem [resolvable:$true] %s40_s20 }
   0x7   :  { %46 = dma.hbm_to_vmem [thread:$0]  %s39_s16, 256, %s41_s20, [#allocation5], %s306_s17, %s306_s17, %s307_s18  }
   0x8   :  { %301 = dma.done.wait [#allocation3], 256  }
   0x9   :  { %302 = vsyncadd [#allocation3], 4294967040 }
   0xa   :  { %303 = dma.done.wait [#allocation5], 256  }
   0xb   :  { %304 = vsyncadd [#allocation5], 4294967040  ;;  %vm74_vm0 = vcmask 261120   ;;  %v72_v0 = vld [vmem:[#allocation4] sm:$0xff]  ;;  %v70_v1 = vld [vmem:[#allocation2] sm:$0xff]  ;;  %vm67_vm1 = vcmask 7168  }
   0xc   :  { %v81_v2 = vsel %vm74_vm0, %v72_v0, -inf  ;;  %v75_v3 = vsel %vm74_vm0, %v70_v1, -inf  ;;  %v73_v4 = vld [vmem:[#allocation4 + $0x8] sm:$0xff]  ;;  %v71_v5 = vld [vmem:[#allocation2 + $0x8] sm:$0xff]  ;;  %v309_v36 = vmov 0.0  }
   0xd   :  { %82 = vmax.xlane.f32.xlu1 %v81_v2  ;;  %76 = vmax.xlane.f32.xlu0 %v75_v3  ;;  %v84_v6 = vsel %vm74_vm0, %v73_v4, -inf  ;;  %v78_v7 = vsel %vm74_vm0, %v71_v5, -inf  ;;  %68 = vst.msk [vmem:[%s382_s2] sm:$0xff] %vm67_vm1, %v309_v36 }
   0xe   :  { %69 = vst.msk [vmem:[%s382_s2 + $0x8] sm:$0xff] %vm67_vm1, %v309_v36 }
  0x15   :  { %85 = vmax.xlane.f32.xlu1 %v84_v6  ;;  %79 = vmax.xlane.f32.xlu0 %v78_v7  ;;  %v212_v36 = vld [vmem:[%s382_s2 + $0x8] sm:$0xff] }
  0x80   :  { %v83_v8 = vpop.xlane.xlu1 %82  ;;  %v77_v9 = vpop.xlane.xlu0 %76 }
  0x81   :  { %v93_v10 = vsub.f32 %v72_v0, %v83_v8  ;;  %v87_v11 = vsub.f32 %v70_v1, %v77_v9 }
  0x83   :  { %v95_v12 = vmul.f32 1.442695, %v93_v10  ;;  %v89_v13 = vmul.f32 1.442695, %v87_v11 }
  0x85   :  { %233 = vpow2.f32 %v95_v12 }
  0x86   :  { %235 = vpow2.f32 %v89_v13 }
  0x88   :  { %v86_v14 = vpop.xlane.xlu1 %85  ;;  %v80_v15 = vpop.xlane.xlu0 %79 }
  0x89   :  { %v94_v16 = vsub.f32 %v73_v4, %v86_v14  ;;  %v88_v17 = vsub.f32 %v71_v5, %v80_v15 }
  0x8b   :  { %v234_v18 = vpop.eup %233  ;;  %v97_v19 = vmul.f32 1.442695, %v94_v16  ;;  %v91_v20 = vmul.f32 1.442695, %v88_v17 }
  0x8c   :  { %v236_v21 = vpop.eup %235  ;;  %v105_v22 = vsel %vm74_vm0, %v234_v18, 0.0  ;;  %v111_v31 = vmul.f32 %v234_v18, %v93_v10 }
  0x8d   :  { %237 = vpow2.f32 %v97_v19  ;;  %106 = vadd.xlane.f32.xlu0 %v105_v22  ;;  %v99_v23 = vsel %vm74_vm0, %v236_v21, 0.0  ;;  %v119_v30 = vmul.f32 %v236_v21, %v234_v18  ;;  %v211_v18 = vld [vmem:[%s382_s2] sm:$0xff] }
  0x8e   :  { %239 = vpow2.f32 %v91_v20  ;;  %100 = vadd.xlane.f32.xlu2 %v99_v23  ;;  %v113_v33 = vsel %vm74_vm0, %v111_v31, 0.0 }
  0x8f   :  { %v121_v32 = vsel %vm74_vm0, %v119_v30, 0.0 }
  0x93   :  { %v238_v24 = vpop.eup %237 }
  0x94   :  { %v240_v25 = vpop.eup %239  ;;  %v108_v26 = vsel %vm74_vm0, %v238_v24, 0.0  ;;  %v112_v27 = vmul.f32 %v238_v24, %v94_v16 }
  0x95   :  { %109 = vadd.xlane.f32.xlu1 %v108_v26  ;;  %v102_v28 = vsel %vm74_vm0, %v240_v25, 0.0  ;;  %v120_v34 = vmul.f32 %v240_v25, %v238_v24 }
  0x96   :  { %103 = vadd.xlane.f32.xlu2 %v102_v28  ;;  %v116_v29 = vsel %vm74_vm0, %v112_v27, 0.0 }
  0x97   :  { %117 = vadd.xlane.f32.xlu0 %v116_v29  ;;  %v124_v35 = vsel %vm74_vm0, %v120_v34, 0.0 }
  0x9d   :  { %122 = vadd.xlane.f32.xlu1 %v121_v32 }
  0x9e   :  { %114 = vadd.xlane.f32.xlu2 %v113_v33 }
  0xa6   :  { %125 = vadd.xlane.f32.xlu2 %v124_v35 }
 0x100   :  { %v107_v37 = vpop.xlane.xlu0 %106 }
 0x101   :  { %v101_v38 = vpop.xlane.xlu2 %100  ;;  %241 = vrcp.f32 %v107_v37  ;;  %v136_v47 = vand.u32 2147483647, %v107_v37  ;;  %v138_v48 = vand.u32 2147483648, %v107_v37  ;;  %vm132_vm4 = vweird.f32 %v107_v37 }
 0x102   :  { %243 = vrcp.f32 %v101_v38  ;;  %v174_v50 = vand.u32 2147483647, %v101_v38  ;;  %v176_v51 = vand.u32 2147483648, %v101_v38  ;;  %vm170_vm5 = vweird.f32 %v101_v38 }
 0x103   :  { %245 = vlog2.f32 %v107_v37  ;;  %vm137_vm7 = vcmp.eq.f32.partialorder %v136_v47, 8.507059e+37  ;;  %v139_v56 = vor.u32 1.1754944e-38, %v138_v48 }
 0x104   :  { %vm175_vm9 = vcmp.eq.f32.partialorder %v174_v50, 8.507059e+37  ;;  %v177_v61 = vor.u32 1.1754944e-38, %v176_v51 }
 0x107   :  { %v242_v39 = vpop.eup %241 }
 0x108   :  { %v244_v40 = vpop.eup %243  ;;  %v128_v41 = vmul.f32 %v242_v39, %v107_v37  ;;  %v351_v42 = vpop.xlane.xlu1 %109  ;;  %vm133_vm2 = vweird.f32 %v242_v39 }
 0x109   :  { %v166_v43 = vmul.f32 %v244_v40, %v101_v38  ;;  %247 = vrcp.f32 %v351_v42  ;;  %v354_v44 = vpop.xlane.xlu2 %103  ;;  %vm171_vm3 = vweird.f32 %v244_v40  ;;  %v246_v53 = vpop.eup %245  ;;  %vm134_vm6 = vmor %vm132_vm4, %vm133_vm2  ;;  %v151_v7 = vand.u32 2147483647, %v351_v42 }
 0x10a   :  { %v129_v45 = vsub.f32 1.0, %v128_v41  ;;  %249 = vrcp.f32 %v354_v44  ;;  %vm172_vm8 = vmor %vm170_vm5, %vm171_vm3  ;;  %v160_v5 = vmul.f32 0.6931472, %v246_v53  ;;  %v153_v8 = vand.u32 2147483648, %v351_v42  ;;  %v118_v26 = vpop.xlane.xlu0 %117 }
 0x10b   :  { %v167_v46 = vsub.f32 1.0, %v166_v43  ;;  %251 = vlog2.f32 %v351_v42  ;;  %v191_v13 = vand.u32 2147483648, %v354_v44  ;;  %v189_v16 = vand.u32 2147483647, %v354_v44 }
 0x10c   :  { %v130_v49 = vmul.f32 %v242_v39, %v129_v45  ;;  %vm147_vm12 = vweird.f32 %v351_v42  ;;  %vm185_vm13 = vweird.f32 %v354_v44  ;;  %v154_v20 = vor.u32 1.1754944e-38, %v153_v8 }
 0x10d   :  { %v168_v52 = vmul.f32 %v244_v40, %v167_v46  ;;  %vm152_vm15 = vcmp.eq.f32.partialorder %v151_v7, 8.507059e+37  ;;  %v192_v24 = vor.u32 1.1754944e-38, %v191_v13  ;;  %vm190_vm2 = vcmp.eq.f32.partialorder %v189_v16, 8.507059e+37 }
 0x10e   :  { %v131_v54 = vadd.f32 %v242_v39, %v130_v49 }
 0x10f   :  { %v248_v55 = vpop.eup %247  ;;  %v169_v57 = vadd.f32 %v244_v40, %v168_v52 }
 0x110   :  { %v250_v58 = vpop.eup %249  ;;  %v143_v59 = vmul.f32 %v248_v55, %v351_v42  ;;  %v135_v60 = vsel %vm134_vm6, %v242_v39, %v131_v54  ;;  %vm148_vm10 = vweird.f32 %v248_v55  ;;  %v123_v11 = vpop.xlane.xlu1 %122 }
 0x111   :  { %v181_v62 = vmul.f32 %v250_v58, %v354_v44  ;;  %v140_v63 = vsel %vm137_vm7, %v139_v56, %v135_v60  ;;  %v173_v0 = vsel %vm172_vm8, %v244_v40, %v169_v57  ;;  %v115_v1 = vpop.xlane.xlu2 %114  ;;  %vm186_vm11 = vweird.f32 %v250_v58  ;;  %v252_v19 = vpop.eup %251  ;;  %vm149_vm14 = vmor %vm147_vm12, %vm148_vm10 }
 0x112   :  { %v144_v2 = vsub.f32 1.0, %v143_v59  ;;  %v178_v3 = vsel %vm175_vm9, %v177_v61, %v173_v0  ;;  %v157_v4 = vmul.f32 %v140_v63, %v115_v1  ;;  %vm187_vm0 = vmor %vm185_vm13, %vm186_vm11  ;;  %v162_v29 = vmul.f32 0.6931472, %v252_v19 }
 0x113   :  { %v182_v6 = vsub.f32 1.0, %v181_v62  ;;  %v179_v9 = vmul.f32 %v178_v3, %v140_v63 }
 0x114   :  { %v145_v10 = vmul.f32 %v248_v55, %v144_v2  ;;  %v163_v12 = vsub.f32 %v157_v4, %v160_v5 }
 0x115   :  { %v183_v14 = vmul.f32 %v250_v58, %v182_v6  ;;  %v195_v15 = vmul.f32 %v179_v9, %v123_v11 }
 0x116   :  { %v146_v17 = vadd.f32 %v248_v55, %v145_v10 }
 0x117   :  { %v197_v21 = vsub.f32 %v163_v12, %v195_v15  ;;  %v184_v22 = vadd.f32 %v250_v58, %v183_v14 }
 0x118   :  { %v150_v23 = vsel %vm149_vm14, %v248_v55, %v146_v17 }
 0x119   :  { %v155_v25 = vsel %vm152_vm15, %v154_v20, %v150_v23  ;;  %v213_v27 = vadd.f32 %v211_v18, %v197_v21  ;;  %v188_v28 = vsel %vm187_vm0, %v250_v58, %v184_v22  ;;  %v126_v34 = vpop.xlane.xlu2 %125 }
 0x11a   :  { %v158_v30 = vmul.f32 %v155_v25, %v118_v26  ;;  %v193_v31 = vsel %vm190_vm2, %v192_v24, %v188_v28 }
 0x11b   :  { %216 = vst.msk [vmem:[%s382_s2] sm:$0xff] %vm67_vm1, %v213_v27  ;;  %v194_v32 = vmul.f32 %v193_v31, %v155_v25 }
 0x11c   :  { %v164_v33 = vsub.f32 %v158_v30, %v162_v29 }
 0x11d   :  { %v196_v35 = vmul.f32 %v194_v32, %v126_v34 }
 0x11f   :  { %v198_v37 = vsub.f32 %v164_v33, %v196_v35 }
 0x121   :  { %v214_v38 = vadd.f32 %v212_v36, %v198_v37 }
 0x123   :  { %217 = vst.msk [vmem:[%s382_s2 + $0x8] sm:$0xff] %vm67_vm1, %v214_v38 }
 0x124   :  { %222 = vsyncpa [#allocation3], 1 }
 0x125   :  { %223 = vsyncpa [#allocation5], 1 }

</bundles_post_ra>
